<compile_context>
chip_gen: v6e
topology: v6e:2x2x1
jax: 0.10.0
libtpu: 0.0.40
codegen_flags: <defaults>
</compile_context>

<pallas_src>
import jax
import jax.numpy as jnp
from jax.experimental import pallas as pl
from jax.experimental.pallas import tpu as pltpu


def fc_relu_kernel(x_ref, w_ref, b_ref, o_ref):
    # x [tB, K], w [K, N], b [1, N], o [tB, N]
    y = jnp.dot(x_ref[...], w_ref[...], preferred_element_type=jnp.float32)
    o_ref[...] = jnp.maximum(y + b_ref[...], 0.0).astype(o_ref.dtype)


def _vmem_budget_bytes():
    """Per-chip VMEM capacity (64 MiB v7x, 128 MiB v5e/v6e); conservative fallback."""
    try:
        info = pltpu.get_tpu_info()
        cap = getattr(info, "vmem_capacity_bytes", None)
        if cap:
            return int(cap)
    except Exception:
        pass
    return 64 * 1024 * 1024


def _launch(xp, wp, bp, tile_rows_cap, vmem_budget):
    """relu(xp @ wp + bp); batch-only tiling, weights VMEM-resident."""
    Bp, K = xp.shape
    _, N = wp.shape
    bytes_per_row = (K + N) * 4
    resident = (wp.size + bp.size) * 4

    # Grid-free while x + out + W + b fit in ~1/4 of VMEM: no pipeline
    # prologue/epilogue, no pointless double-buffering of data read once.
    if Bp * bytes_per_row + resident <= vmem_budget // 4:
        return pl.pallas_call(
            fc_relu_kernel,
            out_shape=jax.ShapeDtypeStruct((Bp, N), jnp.float32),
            in_specs=[
                pl.BlockSpec(memory_space=pltpu.MemorySpace.VMEM),
                pl.BlockSpec(memory_space=pltpu.MemorySpace.VMEM),
                pl.BlockSpec(memory_space=pltpu.MemorySpace.VMEM),
            ],
            out_specs=pl.BlockSpec(memory_space=pltpu.MemorySpace.VMEM),
        )(xp, wp, bp)

    # Gridded path: large batch tiles amortize the ~0.35us per-step overhead;
    # double-buffered footprint is kept under ~1/4 of VMEM.
    tile_rows = min(tile_rows_cap, (vmem_budget // 4) // (2 * bytes_per_row))
    tile_rows = max(8, (tile_rows // 8) * 8)
    n_tiles = pl.cdiv(Bp, tile_rows)
    # No jnp.pad / out[:B]: Pallas masks the ragged final block.
    return pl.pallas_call(
        fc_relu_kernel,
        out_shape=jax.ShapeDtypeStruct((Bp, N), jnp.float32),
        grid=(n_tiles,),
        in_specs=[
            pl.BlockSpec((tile_rows, K), lambda i: (i, 0)),
            pl.BlockSpec((K, N), lambda i: (0, 0)),   # weights resident
            pl.BlockSpec((1, N), lambda i: (0, 0)),   # bias resident
        ],
        out_specs=pl.BlockSpec((tile_rows, N), lambda i: (i, 0)),
        compiler_params=pltpu.CompilerParams(
            dimension_semantics=("parallel",),
            vmem_limit_bytes=min(
                vmem_budget,
                2 * tile_rows * bytes_per_row + resident + (8 << 20)),
        ),
    )(xp, wp, bp)


def simple_body_forward(x, w, b):
    """relu(x @ w + b). x: [B, C], w: [C, F], b: [F] -> [B, F] float32."""
    x = x.astype(jnp.float32)
    B, C = x.shape
    Cw, F = w.shape
    assert C == Cw
    vmem_budget = _vmem_budget_bytes()

    # Lane-dense packing factor: fold G batch rows into the 128-lane axis.
    G = 128 // C if (C < 128 and 128 % C == 0) else 1
    if G > 1:
        Bpad = pl.cdiv(B, G) * G
        xg = x if Bpad == B else jnp.pad(x, ((0, Bpad - B), (0, 0)))
        xp = xg.reshape(Bpad // G, G * C)                         # free reshape
        w_blk = jnp.kron(jnp.eye(G, dtype=jnp.float32),
                         w.astype(jnp.float32))                   # [G*C, G*F]
        b_blk = jnp.tile(b.reshape(1, F).astype(jnp.float32), (1, G))  # [1, G*F]
        out_p = _launch(xp, w_blk, b_blk,
                        tile_rows_cap=4096, vmem_budget=vmem_budget)
        out = out_p.reshape(Bpad, F)                              # free reshape
        return out if Bpad == B else out[:B]

    # Fallback when C doesn't divide 128: original [B,C]@[C,F] layout.
    b2 = b.reshape(1, F).astype(jnp.float32)
    return _launch(x, w.astype(jnp.float32), b2,
                   tile_rows_cap=8192, vmem_budget=vmem_budget)


if __name__ == "__main__":
    # SimpleBody(num_channels) with out_feats = 32
    num_channels = 16
    out_feats = 32

    key = jax.random.PRNGKey(0)
    kx, kw, kb, kx2 = jax.random.split(key, 4)

    # PyTorch Linear default init: U(-1/sqrt(fan_in), 1/sqrt(fan_in)); weight
    # kept as [C, F] (transposed vs PyTorch's [F, C]).
    bound = 1.0 / jnp.sqrt(jnp.float32(num_channels))
    w = jax.random.uniform(kw, (num_channels, out_feats), jnp.float32,
                           minval=-bound, maxval=bound)
    b = jax.random.uniform(kb, (out_feats,), jnp.float32,
                           minval=-bound, maxval=bound)

    # Batch divisible by the packing factor (8): pure lane-dense path.
    x = jax.random.normal(kx, (8, num_channels), jnp.float32)
    out = simple_body_forward(x, w, b)
    jax.block_until_ready(out)
    ref = jnp.maximum(x @ w + b[None, :], 0.0)
    assert out.shape == (8, out_feats)
    assert jnp.allclose(out, ref, atol=1e-5, rtol=1e-5)

    # Ragged batch (exercises the tiny tail pad/slice in the packer).
    x2 = jax.random.normal(kx2, (13, num_channels), jnp.float32)
    out2 = simple_body_forward(x2, w, b)
    jax.block_until_ready(out2)
    ref2 = jnp.maximum(x2 @ w + b[None, :], 0.0)
    assert out2.shape == (13, out_feats)
    assert jnp.allclose(out2, ref2, atol=1e-5, rtol=1e-5)

    print("KERNEL_OK")
</pallas_src>

<mosaic_0001>
module attributes {stable_mosaic.version = 11 : i64} {
  func.func @fc_relu_kernel(%arg0: memref<1x128xf32, #tpu.memory_space<vmem>>, %arg1: memref<128x256xf32, #tpu.memory_space<vmem>>, %arg2: memref<1x256xf32, #tpu.memory_space<vmem>>, %arg3: memref<1x256xf32, #tpu.memory_space<vmem>>) attributes {dimension_semantics = [], scalar_prefetch = 0 : i64, scratch_operands = 0 : i64, tpu.core_type = #tpu.core_type<tc>} {
    %c0 = arith.constant 0 : index
    %c0_0 = arith.constant 0 : index
    %0 = vector.load %arg0[%c0, %c0_0] : memref<1x128xf32, #tpu.memory_space<vmem>>, vector<1x128xf32>
    %c0_1 = arith.constant 0 : index
    %c0_2 = arith.constant 0 : index
    %1 = vector.load %arg1[%c0_1, %c0_2] : memref<128x256xf32, #tpu.memory_space<vmem>>, vector<128x256xf32>
    %cst = arith.constant dense<0.000000e+00> : vector<1x256xf32>
    %2 = tpu.matmul %0, %1, %cst {dimension_numbers = #tpu.dot_dimension_numbers<[1], [0], [0], [1], [0, 0, 1, 1], [], []>} : vector<1x128xf32>, vector<128x256xf32>, vector<1x256xf32> -> vector<1x256xf32>
    %c0_3 = arith.constant 0 : index
    %c0_4 = arith.constant 0 : index
    %3 = vector.load %arg2[%c0_3, %c0_4] : memref<1x256xf32, #tpu.memory_space<vmem>>, vector<1x256xf32>
    %4 = arith.addf %2, %3 : vector<1x256xf32>
    %cst_5 = arith.constant 0.000000e+00 : f32
    %5 = vector.broadcast %cst_5 : f32 to vector<1x256xf32>
    %6 = arith.maximumf %4, %5 : vector<1x256xf32>
    %c0_6 = arith.constant 0 : index
    %c0_7 = arith.constant 0 : index
    %7 = vector.load %arg3[%c0_6, %c0_7] : memref<1x256xf32, #tpu.memory_space<vmem>>, vector<1x256xf32>
    tpu.vector_store %arg3[%c0_6, %c0_7], %6 {strides = array<i32>} : memref<1x256xf32, #tpu.memory_space<vmem>>, vector<1x256xf32>,
    return
  }
}

</mosaic_0001>

<bundles_post_ra>
// kernel: tpu_custom_call.1
= control target key start
LH: loop header
LB: loop body
LE: loop exit
PB: predicated region body
PF: predicated region fallthrough
CT: control target
= control target key end

     0   :  { %8 = vsyncpa [#allocation3], 0  ;;  %s310_s0 = inlined_call_operand.hbm [shape: f32[1,128], index: 0, kind: input, shape index: {}]   ;;  %s311_s1 = inlined_call_operand.hbm [shape: f32[128,256], index: 1, kind: input, shape index: {}]   ;;  %s312_s2 = inlined_call_operand.vmem [shape: f32[1,256], index: 2, kind: input, shape index: {}]   ;;  %s313_s3 = inlined_call_operand.hbm [shape: f32[1,256], index: 3, kind: output, shape index: {}]  }
   0x1   :  { %9 = vsyncpa [#allocation6], 0 }
   0x2   :  { %10 = vsyncpa [#allocation4], 0  ;;  %s271_s12 = smov [#allocation2]   ;;  %s272_s14 = smov [#allocation5]  }
   0x3   :  { %s17_s13 = sshll.u32 %s271_s12, 4  ;;  %s26_s15 = sshll.u32 %s272_s14, 4  ;;  %s18_s13 = int_to_ptr.vmem [resolvable:$true] %s17_s13  ;;  %s27_s15 = int_to_ptr.vmem [resolvable:$true] %s26_s15 }
   0x4   :  { %s213_s16 = scalar_lea.vmem %s18_s13, 16  ;;  %s217_s17 = scalar_lea.vmem %s18_s13, 32 }
   0x5   :  { %p214_p0 = scmp.ne.s32.totalorder %s18_s13, %s213_s16  ;;  %p218_p1 = scmp.lt.s32.totalorder %s18_s13, %s18_s13 }
   0x6   :  { %p219_p2 = scmp.lt.s32.totalorder %s217_s17, %s213_s16 }
   0x8   :  { %p220_p3 = por %p219_p2, %p218_p1 }
   0xa   :  { %p221_p4 = pnand %p220_p3, %p214_p0 }
   0xc   :  { %224 = shalt.err (!%p221_p4)
}
   0xd   :  { %20 = dma.hbm_to_vmem [thread:$0]  %s310_s0, 16, %s18_s13, [#allocation3]  }
   0xe   :  { %s233_s20 = scalar_lea.vmem %s27_s15, 4096  ;;  %p238_p6 = scmp.lt.s32.totalorder %s27_s15, %s27_s15 }
   0xf   :  { %p234_p5 = scmp.ne.s32.totalorder %s27_s15, %s233_s20  ;;  %p239_p7 = scmp.lt.s32.totalorder %s233_s20, %s233_s20 }
  0x11   :  { %p240_p8 = por %p239_p7, %p238_p6 }
  0x13   :  { %p241_p9 = pnand %p240_p8, %p234_p5 }
  0x15   :  { %244 = shalt.err (!%p241_p9)
}
  0x16   :  { %s273_s21 = smov 256   ;;  %s274_s22 = smov 16  }
  0x17   :  { %32 = dma.hbm_to_vmem [thread:$0]  %s311_s1, 4096, %s27_s15, [#allocation6], %s273_s21, %s273_s21, %s274_s22  }
  0x18   :  { %265 = dma.done.wait [#allocation3], 16  }
  0x19   :  { %266 = vsyncadd [#allocation3], 4294967280 }
  0x1a   :  { %267 = dma.done.wait [#allocation6], 4096  }
  0x1b   :  { %268 = vsyncadd [#allocation6], 4294963200  ;;  %v275_v0 = vmov 0.0   ;;  %v73_v1 = vld [vmem:[#allocation5 + $0xf8] sm:$0xff]  ;;  %v72_v2 = vld [vmem:[#allocation5 + $0xf0] sm:$0xff]  ;;  %v76_v34 = vlaneseq  ;;  %s277_s25 = smov [#allocation7]  }
  0x1c   :  { %150 = vmatprep.mubr.f32.mxu0 %v275_v0  ;;  %v71_v3 = vld [vmem:[#allocation5 + $0xe8] sm:$0xff]  ;;  %86 = vmatprep.subr.mxu0 %v73_v1  ;;  %v70_v4 = vld [vmem:[#allocation5 + $0xe0] sm:$0xff]  ;;  %v69_v5 = vld [vmem:[#allocation5 + $0xd8] sm:$0xff]  ;;  %v276_v40 = vmov 1966171168   ;;  %s188_s26 = sshll.u32 %s277_s25, 4  ;;  %s189_s26 = int_to_ptr.vmem [resolvable:$true] %s188_s26 }
  0x1d   :  { %87 = vmatpush1.msra.mxu0 %v72_v2  ;;  %v68_v6 = vld [vmem:[#allocation5 + $0xd0] sm:$0xff]  ;;  %v67_v7 = vld [vmem:[#allocation5 + $0xc8] sm:$0xff]  ;;  %v66_v8 = vld [vmem:[#allocation5 + $0xc0] sm:$0xff]  ;;  %v77_v35 = vshrl.u32 %v76_v34, 7  ;;  %v163_v41 = vunpack.c.l.s4 %v276_v40  ;;  %vm179_vm0 = vcmp.lt.s32.totalorder %v76_v34, 256  ;;  %p250_p11 = scmp.lt.s32.totalorder %s189_s26, %s189_s26 }
  0x1e   :  { %88 = vmatprep.subr.mxu0 %v71_v3  ;;  %v65_v9 = vld [vmem:[#allocation5 + $0xb8] sm:$0xff]  ;;  %v64_v10 = vld [vmem:[#allocation5 + $0xb0] sm:$0xff]  ;;  %v63_v11 = vld [vmem:[#allocation5 + $0xa8] sm:$0xff] }
  0x1f   :  { %89 = vmatpush1.msra.mxu0 %v70_v4  ;;  %v62_v12 = vld [vmem:[#allocation5 + $0xa0] sm:$0xff]  ;;  %v61_v13 = vld [vmem:[#allocation5 + $0x98] sm:$0xff]  ;;  %v60_v14 = vld [vmem:[#allocation5 + $0x90] sm:$0xff]  ;;  %v78_v36 = vsub.s32 0, %v77_v35  ;;  %v82_v38 = vsub.s32 1, %v77_v35  ;;  %v164_v45 = vunpack.c.0.s8 %v163_v41 }
  0x20   :  { %90 = vmatprep.subr.mxu0 %v69_v5  ;;  %v59_v15 = vld [vmem:[#allocation5 + $0x88] sm:$0xff]  ;;  %v58_v16 = vld [vmem:[#allocation5 + $0x80] sm:$0xff]  ;;  %v57_v17 = vld [vmem:[#allocation5 + $0x78] sm:$0xff] }
  0x21   :  { %91 = vmatpush1.msra.mxu0 %v68_v6  ;;  %v56_v18 = vld [vmem:[#allocation5 + $0x70] sm:$0xff]  ;;  %v55_v19 = vld [vmem:[#allocation5 + $0x68] sm:$0xff]  ;;  %v54_v20 = vld [vmem:[#allocation5 + $0x60] sm:$0xff]  ;;  %v167_v50 = vsub.s32 %v164_v45, %v77_v35 }
  0x22   :  { %92 = vmatprep.subr.mxu0 %v67_v7  ;;  %v53_v21 = vld [vmem:[#allocation5 + $0x58] sm:$0xff]  ;;  %v52_v22 = vld [vmem:[#allocation5 + $0x50] sm:$0xff]  ;;  %v51_v23 = vld [vmem:[#allocation5 + $0x48] sm:$0xff] }
  0x23   :  { %93 = vmatpush1.msra.mxu0 %v66_v8  ;;  %v50_v24 = vld [vmem:[#allocation5 + $0x40] sm:$0xff]  ;;  %v49_v25 = vld [vmem:[#allocation5 + $0x38] sm:$0xff]  ;;  %v48_v26 = vld [vmem:[#allocation5 + $0x30] sm:$0xff] }
  0x24   :  { %94 = vmatprep.subr.mxu0 %v65_v9  ;;  %v47_v27 = vld [vmem:[#allocation5 + $0x28] sm:$0xff]  ;;  %v46_v28 = vld [vmem:[#allocation5 + $0x20] sm:$0xff]  ;;  %v45_v29 = vld [vmem:[#allocation5 + $0x18] sm:$0xff] }
  0x25   :  { %95 = vmatpush1.msra.mxu0 %v64_v10  ;;  %v44_v30 = vld [vmem:[#allocation5 + $0x10] sm:$0xff]  ;;  %v43_v31 = vld [vmem:[#allocation5 + $0x8] sm:$0xff]  ;;  %v42_v32 = vld [vmem:[#allocation5] sm:$0xff] }
  0x26   :  { %96 = vmatprep.subr.mxu0 %v63_v11  ;;  %v41_v33 = vld [vmem:[#allocation2] sm:$0x1] }
  0x27   :  { %97 = vmatpush1.msra.mxu0 %v62_v12  ;;  %v74_v37 = vld [vmem:[%s312_s2] sm:$0x3]  ;;  %s245_s2 = scalar_lea.vmem %s189_s26, 32 }
  0x28   :  { %98 = vmatprep.subr.mxu0 %v61_v13  ;;  %v79_v39 = vrot.slane %v74_v37, %v78_v36  ;;  %v83_v42 = vrot.slane %v74_v37, %v82_v38  ;;  %p246_p10 = scmp.ne.s32.totalorder %s189_s26, %s245_s2  ;;  %p251_p12 = scmp.lt.s32.totalorder %s245_s2, %s245_s2 }
  0x29   :  { %99 = vmatpush1.msra.mxu0 %v60_v14 }
  0x2a   :  { %100 = vmatprep.subr.mxu0 %v59_v15  ;;  %p252_p13 = por %p251_p12, %p250_p11 }
  0x2b   :  { %101 = vmatpush1.msra.mxu0 %v58_v16 }
  0x2c   :  { %102 = vmatprep.subr.mxu0 %v57_v17  ;;  %p253_p0 = pnand %p252_p13, %p246_p10 }
  0x2d   :  { %103 = vmatpush1.msra.mxu0 %v56_v18 }
  0x2e   :  { %104 = vmatprep.subr.mxu0 %v55_v19 }
  0x2f   :  { %105 = vmatpush1.msra.mxu0 %v54_v20 }
  0x30   :  { %106 = vmatprep.subr.mxu0 %v53_v21 }
  0x31   :  { %107 = vmatpush1.msra.mxu0 %v52_v22 }
  0x32   :  { %108 = vmatprep.subr.mxu0 %v51_v23 }
  0x33   :  { %109 = vmatpush1.msra.mxu0 %v50_v24 }
  0x34   :  { %110 = vmatprep.subr.mxu0 %v49_v25 }
  0x35   :  { %111 = vmatpush1.msra.mxu0 %v48_v26 }
  0x36   :  { %112 = vmatprep.subr.mxu0 %v47_v27 }
  0x37   :  { %113 = vmatpush1.msra.mxu0 %v46_v28 }
  0x38   :  { %114 = vmatprep.subr.mxu0 %v45_v29 }
  0x39   :  { %115 = vmatpush1.msra.mxu0 %v44_v30 }
  0x3a   :  { %116 = vmatprep.subr.mxu0 %v43_v31 }
  0x3b   :  { %117 = vmatpush1.msra.mxu0 %v42_v32 }
  0x3c   :  { %151 = vmatmul.mubr.f32.vlgmr.msra.gmra.mxu0 %v41_v33 }
  0xfc   :  { %v152_v43 = vpop.f32.mrf.mxu0 }
  0xfd   :  { %v153_v44 = vadd.f32 %v152_v43, %v79_v39 }
  0xfe   :  { %v154_v46 = vpop.f32.mrf.mxu0 }
  0xff   :  { %v155_v47 = vadd.f32 %v154_v46, %v83_v42  ;;  %v157_v48 = vmax.f32 %v153_v44, 0.0 }
 0x101   :  { %v158_v49 = vmax.f32 %v155_v47, 0.0 }
 0x103   :  { %v161_v51 = vcombine.low %v157_v48, %v158_v49 }
 0x105   :  { %v168_v52 = vrot.slane %v161_v51, %v167_v50 }
 0x107   :  { %v175_v53 = vrot.slane %v168_v52, %v167_v50 }
 0x109   :  { %181 = vst.msk [vmem:[#allocation7] sm:$0x3] %vm179_vm0, %v175_v53 }
 0x10a   :  { %256 = shalt.err (!%p253_p0)
}
 0x10b   :  { %191 = dma.vmem_to_hbm [thread:$0]  %s189_s26, 32, %s313_s3, [#allocation4]  }
 0x10c   :  { %269 = dma.done.wait [#allocation4], 32  }
 0x10d   :  { %270 = vsyncadd [#allocation4], 4294967264 }
 0x10e   :  { %195 = vsyncpa [#allocation3], 1 }
 0x10f   :  { %196 = vsyncpa [#allocation6], 1 }
 0x110   :  { %197 = vsyncpa [#allocation4], 1 }

</bundles_post_ra>
